<compile_context>
chip_gen: v7x
topology: tpu7x:2x2x1
jax: 0.10.0
libtpu: 0.0.40
codegen_flags: <defaults>
</compile_context>

<pallas_src>
import functools

import jax
import jax.numpy as jnp
from jax.experimental import pallas as pl
from jax.experimental.pallas import tpu as pltpu


def _dwconv1d_kernel(halo_ref, x_ref, w_ref, b_ref, o_ref, *, K, pad_l, sr, ch):
    # halo_ref: (TR, K-1)  [left halo (pad_l cols) | right halo (pad_r cols)] for this tile
    # x_ref:    (TR, TL)   unpadded input tile (rows = fused batch*channel)
    # w_ref:    (TR, K)    depthwise weights (PyTorch (C,1,K) squeezed, tiled over batch)
    # b_ref:    (TR, 1)    bias
    # o_ref:    (TR, TL)   output tile
    TR, TL = o_ref.shape

    # Tiny weight/bias loads + f32 casts hoisted out of all chunk loops.
    w = w_ref[...].astype(jnp.float32)   # (TR, K)
    b = b_ref[...].astype(jnp.float32)   # (TR, 1)

    for r0 in range(0, TR, sr):          # sublane chunks
        rs = min(sr, TR - r0)
        # Per-tap weight columns / bias for this row chunk, hoisted out of the lane-chunk
        # loop (JAX does not CSE broadcast_in_dim; keep these a fixed per-step cost).
        w_cols = [w[r0:r0 + rs, j:j + 1] for j in range(K)]
        b_r = b[r0:r0 + rs, :]

        for c0 in range(0, TL, ch):      # lane chunks
            cs = min(ch, TL - c0)
            lo = c0                      # chunk window start, padded coordinates
            hi = c0 + cs + K - 1         # chunk window end (exclusive), padded coordinates

            # Assemble the padded window chunk from halo + x with static slices (the
            # concatenation only happens for the tile-edge chunks).
            pieces = []
            if lo < pad_l:                                   # left halo / reflection
                pieces.append(halo_ref[r0:r0 + rs, lo:pad_l])
            x_lo = max(lo - pad_l, 0)
            x_hi = min(hi - pad_l, TL)
            if x_hi > x_lo:
                pieces.append(x_ref[r0:r0 + rs, x_lo:x_hi])
            if hi > pad_l + TL:                              # right halo / reflection
                pieces.append(halo_ref[r0:r0 + rs, pad_l:pad_l + (hi - pad_l - TL)])
            win = pieces[0] if len(pieces) == 1 else jnp.concatenate(pieces, axis=-1)
            win = win.astype(jnp.float32)     # upcast ONCE per chunk (not per tap)

            # f32 chunk accumulator stays in registers across all K taps (no VMEM spill).
            acc = win[:, 0:cs] * w_cols[0]
            for j in range(1, K):
                acc = acc + win[:, j:j + cs] * w_cols[j]
            o_ref[r0:r0 + rs, c0:c0 + cs] = (acc + b_r).astype(o_ref.dtype)


def _vmem_capacity_bytes():
    try:
        cap = getattr(pltpu.get_tpu_info(), "vmem_capacity_bytes", None)
        if cap:
            return int(cap)
    except Exception:
        pass
    return 64 * 2**20   # conservative default (v7x per-TC)


def _vmem_need_bytes(TR, TL, K, itemsize):
    # double-buffered input + output blocks, plus halo / weight / bias blocks (coarse bound)
    return itemsize * TR * (4 * TL + 4 * (K - 1) + 2 * (K + 1)) + 64 * TR


def _pick_tiles(R, L, K, itemsize, vmem_budget):
    """Pick (row tile, length tile). Length tiles are lane-dense multiples of 128 dividing L
    (or L itself for ragged lengths -> masked stores, correct but slower); row tiles are
    multiples of 8 dividing R (or R itself)."""
    if L % 128 == 0:
        tl_cands = [t for t in (2048, 1024, 512, 256, 128) if L % t == 0 and t >= K - 1]
        if not tl_cands:
            tl_cands = [L]
    else:
        tl_cands = [L]
    tr_cands = [t for t in (128, 64, 32, 16, 8) if R % t == 0] or [R]
    for tl in tl_cands:
        for tr in tr_cands:
            if _vmem_need_bytes(tr, tl, K, itemsize) <= vmem_budget:
                return tr, tl
    return tr_cands[-1], tl_cands[-1]


def depthwise_conv1d(x, weight, bias, *, kernel_size, causal=False, tile_l=None, tile_r=None):
    """Forward pass of DepthwiseConv1d.

    x:      (N, C, L)
    weight: (C, K)   depthwise conv weights (PyTorch (C, 1, K) squeezed)
    bias:   (C,)
    Returns (N, C, L).
    """
    N, C, L = x.shape
    K = int(kernel_size)
    if K < 1:
        raise ValueError("kernel_size must be >= 1")
    if K == 1:
        # Degenerate pointwise case: no padding / halo needed.
        return (x.astype(jnp.float32) * weight[None, :, :1].astype(jnp.float32)
                + bias[None, :, None].astype(jnp.float32)).astype(x.dtype)

    if causal:
        pad_l, pad_r = 0, K - 1
    else:
        if K % 2 == 0:
            # TODO(synk): even kernel_size with causal=False gives L_out = L + 1 in the PyTorch
            # module; the tiled kernel only supports L_out == L configurations.
            raise NotImplementedError("even kernel_size with causal=False is not supported")
        pad_l = pad_r = K // 2
    if max(pad_l, pad_r) > L - 1:
        raise ValueError("reflection padding requires pad <= L - 1")

    R = N * C
    itemsize = jnp.dtype(x.dtype).itemsize
    cap = _vmem_capacity_bytes()
    budget = max(16 * 2**20, min(cap // 2, 48 * 2**20))

    TR, TL = _pick_tiles(R, L, K, itemsize, budget)
    if tile_l is not None:
        TL = int(tile_l)
        if L % TL != 0 or (TL % 128 != 0 and TL != L) or (TL != L and TL < K - 1):
            raise ValueError("tile_l must divide L, be a multiple of 128 (or == L), and >= K-1")
    if tile_r is not None:
        TR = int(tile_r)
        if R % TR != 0 or (TR % 8 != 0 and TR != R):
            raise ValueError("tile_r must divide N*C and be a multiple of 8 (or == N*C)")
    nLT = L // TL
    if nLT > 1 and (pad_l > TL or pad_r > TL):
        TL, nLT = L, 1            # halos may only reach into adjacent tiles
    nRT = R // TR

    # Fuse batch into the channel/sublane axis so small C still fills vregs.
    x2 = x.reshape(R, L)
    w2 = jnp.tile(weight, (N, 1))               # (R, K)
    b2 = jnp.tile(bias, N).reshape(R, 1)        # (R, 1)

    # --- Per-length-tile halo, shape (nLT, R, K-1): [left pad_l | right pad_r].
    # Built from static slices / flips of x (cheap copies) -- no gather, no padded x copy. ---
    parts = []
    if pad_l > 0:
        first_left = jnp.flip(x2[:, 1:1 + pad_l], axis=-1)[None]            # tile 0: reflect
        if nLT > 1:
            xr = x2.reshape(R, nLT, TL)
            left_int = jnp.transpose(xr[:, :-1, TL - pad_l:], (1, 0, 2))     # tiles 1..: prev edge
            left = jnp.concatenate([first_left, left_int], axis=0)
        else:
            left = first_left
        parts.append(left)
    if pad_r > 0:
        last_right = jnp.flip(x2[:, L - 1 - pad_r:L - 1], axis=-1)[None]     # last tile: reflect
        if nLT > 1:
            xr = x2.reshape(R, nLT, TL)
            right_int = jnp.transpose(xr[:, 1:, :pad_r], (1, 0, 2))          # tiles ..-2: next edge
            right = jnp.concatenate([right_int, last_right], axis=0)
        else:
            right = last_right
        parts.append(right)
    halo = parts[0] if len(parts) == 1 else jnp.concatenate(parts, axis=-1)  # (nLT, R, K-1)

    sr = min(16, TR)        # sublane chunk: one bf16 vreg worth of rows (2 f32 vreg rows)
    ch = min(512, TL)       # lane chunk: keeps the f32 window + accumulator well inside 64 vregs

    need = _vmem_need_bytes(TR, TL, K, itemsize)
    vmem_limit = int(min(max(2 * need, 32 * 2**20), max(cap // 2, 32 * 2**20)))

    kernel = functools.partial(_dwconv1d_kernel, K=K, pad_l=pad_l, sr=sr, ch=ch)

    # Note (v7x megacore): both grid axes are "parallel"; for best balance nRT*nLT should be
    # even -- with the default tiling that holds whenever R or L has a spare factor of 2.
    out = pl.pallas_call(
        kernel,
        out_shape=jax.ShapeDtypeStruct((R, L), x.dtype),
        grid_spec=pltpu.PrefetchScalarGridSpec(
            num_scalar_prefetch=0,
            grid=(nRT, nLT),
            in_specs=[
                # halo: (nLT, R, K-1) -> kernel sees (TR, K-1)
                pl.BlockSpec((None, TR, K - 1), lambda r, l: (l, r, 0)),
                # x: (R, L) -> (TR, TL), non-overlapping tiles (x read exactly once)
                pl.BlockSpec((TR, TL), lambda r, l: (r, l)),
                # weight / bias: block index constant along the length axis -> resident per row tile
                pl.BlockSpec((TR, K), lambda r, l: (r, 0)),
                pl.BlockSpec((TR, 1), lambda r, l: (r, 0)),
            ],
            out_specs=pl.BlockSpec((TR, TL), lambda r, l: (r, l)),
        ),
        compiler_params=pltpu.CompilerParams(
            dimension_semantics=("parallel", "parallel"),
            vmem_limit_bytes=vmem_limit,
        ),
    )(halo, x2, w2, b2)
    return out.reshape(N, C, L)


def _reference(x, weight, bias, *, kernel_size, causal=False):
    """Pure-JAX reference: nn.ReflectionPad1d + depthwise nn.Conv1d."""
    K = kernel_size
    pad_l, pad_r = (0, K - 1) if causal else (K // 2, K // 2)
    xp = jnp.pad(x, ((0, 0), (0, 0), (pad_l, pad_r)), mode="reflect")
    L_out = xp.shape[-1] - K + 1
    out = jnp.zeros(x.shape[:2] + (L_out,), jnp.float32)
    for j in range(K):
        out = out + xp[:, :, j:j + L_out].astype(jnp.float32) * weight[None, :, j:j + 1].astype(jnp.float32)
    return (out + bias[None, :, None].astype(jnp.float32)).astype(x.dtype)


if __name__ == "__main__":
    channels, kernel_size, batch, length = 4, 7, 2, 16

    key = jax.random.PRNGKey(0)
    kx, kw, kb, kx2, kx3 = jax.random.split(key, 5)

    x = jax.random.normal(kx, (batch, channels, length), dtype=jnp.float32)
    weight = jax.random.normal(kw, (channels, kernel_size), dtype=jnp.float32) * 0.1
    bias = jax.random.normal(kb, (channels,), dtype=jnp.float32) * 0.1

    # 1) Small demo shape (matches the module example), non-causal.
    out = depthwise_conv1d(x, weight, bias, kernel_size=kernel_size, causal=False)
    out = jax.block_until_ready(out)
    ref = _reference(x, weight, bias, kernel_size=kernel_size, causal=False)
    assert out.shape == ref.shape, (out.shape, ref.shape)
    assert jnp.allclose(out, ref, atol=1e-5, rtol=1e-5), "mismatch vs reference (non-causal)"

    # 2) Causal variant (right reflection pad, matching the PyTorch module).
    out_c = depthwise_conv1d(x, weight, bias, kernel_size=kernel_size, causal=True)
    ref_c = _reference(x, weight, bias, kernel_size=kernel_size, causal=True)
    assert jnp.allclose(out_c, ref_c, atol=1e-5, rtol=1e-5), "mismatch vs reference (causal)"

    # 3) Multi-tile path: lane-dense 128-wide length tiles with cross-tile halos.
    x2 = jax.random.normal(kx2, (batch, channels, 512), dtype=jnp.float32)
    out_t = depthwise_conv1d(x2, weight, bias, kernel_size=kernel_size, causal=False, tile_l=128)
    ref_t = _reference(x2, weight, bias, kernel_size=kernel_size, causal=False)
    assert jnp.allclose(out_t, ref_t, atol=1e-5, rtol=1e-5), "mismatch vs reference (tiled)"

    # 4) bf16, multi-tile, wider channel count (exercises fused rows + chunked f32 accumulation).
    c3 = 8
    x3 = jax.random.normal(kx3, (batch, c3, 256), dtype=jnp.bfloat16)
    w3 = (jax.random.normal(kw, (c3, kernel_size), dtype=jnp.float32) * 0.1).astype(jnp.bfloat16)
    b3 = (jax.random.normal(kb, (c3,), dtype=jnp.float32) * 0.1).astype(jnp.bfloat16)
    out_b = depthwise_conv1d(x3, w3, b3, kernel_size=kernel_size, causal=False, tile_l=128)
    ref_b = _reference(x3, w3, b3, kernel_size=kernel_size, causal=False)
    assert jnp.allclose(out_b.astype(jnp.float32), ref_b.astype(jnp.float32),
                        atol=2e-2, rtol=2e-2), "mismatch vs reference (bf16 tiled)"

    print("KERNEL_OK")
</pallas_src>

<mosaic_0001>
module attributes {stable_mosaic.version = 11 : i64} {
  func.func @_dwconv1d_kernel(%arg0: i32, %arg1: i32, %arg2: memref<1x8x6xf32, #tpu.memory_space<vmem>>, %arg3: memref<8x16xf32, #tpu.memory_space<vmem>>, %arg4: memref<8x7xf32, #tpu.memory_space<vmem>>, %arg5: memref<8x1xf32, #tpu.memory_space<vmem>>, %arg6: memref<8x16xf32, #tpu.memory_space<vmem>>) attributes {dimension_semantics = [#tpu.dimension_semantics<parallel>, #tpu.dimension_semantics<parallel>], iteration_bounds = array<i64: 1, 1>, scalar_prefetch = 0 : i64, scratch_operands = 0 : i64, tpu.core_type = #tpu.core_type<tc>, window_params = [{transform_indices = @transform_0, window_bounds = array<i64: 1, 8, 6>}, {transform_indices = @transform_1, window_bounds = array<i64: 8, 16>}, {transform_indices = @transform_2, window_bounds = array<i64: 8, 7>}, {transform_indices = @transform_3, window_bounds = array<i64: 8, 1>}, {transform_indices = @transform_4, window_bounds = array<i64: 8, 16>}]} {
    %c0 = arith.constant 0 : index
    %c0_0 = arith.constant 0 : index
    %0 = vector.load %arg4[%c0, %c0_0] : memref<8x7xf32, #tpu.memory_space<vmem>>, vector<8x7xf32>
    %c0_1 = arith.constant 0 : index
    %c0_2 = arith.constant 0 : index
    %1 = vector.load %arg5[%c0_1, %c0_2] : memref<8x1xf32, #tpu.memory_space<vmem>>, vector<8x1xf32>
    %2 = vector.extract_strided_slice %0 {offsets = [0, 0], sizes = [8, 1], strides = [1, 1]} : vector<8x7xf32> to vector<8x1xf32>
    %3 = vector.extract_strided_slice %0 {offsets = [0, 1], sizes = [8, 1], strides = [1, 1]} : vector<8x7xf32> to vector<8x1xf32>
    %4 = vector.extract_strided_slice %0 {offsets = [0, 2], sizes = [8, 1], strides = [1, 1]} : vector<8x7xf32> to vector<8x1xf32>
    %5 = vector.extract_strided_slice %0 {offsets = [0, 3], sizes = [8, 1], strides = [1, 1]} : vector<8x7xf32> to vector<8x1xf32>
    %6 = vector.extract_strided_slice %0 {offsets = [0, 4], sizes = [8, 1], strides = [1, 1]} : vector<8x7xf32> to vector<8x1xf32>
    %7 = vector.extract_strided_slice %0 {offsets = [0, 5], sizes = [8, 1], strides = [1, 1]} : vector<8x7xf32> to vector<8x1xf32>
    %8 = vector.extract_strided_slice %0 {offsets = [0, 6], sizes = [8, 1], strides = [1, 1]} : vector<8x7xf32> to vector<8x1xf32>
    %c0_3 = arith.constant 0 : index
    %c0_4 = arith.constant 0 : index
    %c0_5 = arith.constant 0 : index
    %9 = vector.load %arg2[%c0_3, %c0_4, %c0_5] : memref<1x8x6xf32, #tpu.memory_space<vmem>>, vector<1x8x3xf32>
    %10 = vector.shape_cast %9 : vector<1x8x3xf32> to vector<8x3xf32>
    %c0_6 = arith.constant 0 : index
    %c0_7 = arith.constant 0 : index
    %11 = vector.load %arg3[%c0_6, %c0_7] : memref<8x16xf32, #tpu.memory_space<vmem>>, vector<8x16xf32>
    %c0_8 = arith.constant 0 : index
    %c0_9 = arith.constant 0 : index
    %c3 = arith.constant 3 : index
    %12 = vector.load %arg2[%c0_8, %c0_9, %c3] : memref<1x8x6xf32, #tpu.memory_space<vmem>>, vector<1x8x3xf32>
    %13 = vector.shape_cast %12 : vector<1x8x3xf32> to vector<8x3xf32>
    %14 = tpu.concatenate %10, %11, %13 in 1 : vector<8x3xf32>, vector<8x16xf32>, vector<8x3xf32> -> vector<8x22xf32>
    %15 = vector.extract_strided_slice %14 {offsets = [0, 0], sizes = [8, 16], strides = [1, 1]} : vector<8x22xf32> to vector<8x16xf32>
    %16 = vector.broadcast %2 : vector<8x1xf32> to vector<8x16xf32>
    %17 = arith.mulf %15, %16 : vector<8x16xf32>
    %18 = vector.extract_strided_slice %14 {offsets = [0, 1], sizes = [8, 16], strides = [1, 1]} : vector<8x22xf32> to vector<8x16xf32>
    %19 = vector.broadcast %3 : vector<8x1xf32> to vector<8x16xf32>
    %20 = arith.mulf %18, %19 : vector<8x16xf32>
    %21 = arith.addf %17, %20 : vector<8x16xf32>
    %22 = vector.extract_strided_slice %14 {offsets = [0, 2], sizes = [8, 16], strides = [1, 1]} : vector<8x22xf32> to vector<8x16xf32>
    %23 = vector.broadcast %4 : vector<8x1xf32> to vector<8x16xf32>
    %24 = arith.mulf %22, %23 : vector<8x16xf32>
    %25 = arith.addf %21, %24 : vector<8x16xf32>
    %26 = vector.extract_strided_slice %14 {offsets = [0, 3], sizes = [8, 16], strides = [1, 1]} : vector<8x22xf32> to vector<8x16xf32>
    %27 = vector.broadcast %5 : vector<8x1xf32> to vector<8x16xf32>
    %28 = arith.mulf %26, %27 : vector<8x16xf32>
    %29 = arith.addf %25, %28 : vector<8x16xf32>
    %30 = vector.extract_strided_slice %14 {offsets = [0, 4], sizes = [8, 16], strides = [1, 1]} : vector<8x22xf32> to vector<8x16xf32>
    %31 = vector.broadcast %6 : vector<8x1xf32> to vector<8x16xf32>
    %32 = arith.mulf %30, %31 : vector<8x16xf32>
    %33 = arith.addf %29, %32 : vector<8x16xf32>
    %34 = vector.extract_strided_slice %14 {offsets = [0, 5], sizes = [8, 16], strides = [1, 1]} : vector<8x22xf32> to vector<8x16xf32>
    %35 = vector.broadcast %7 : vector<8x1xf32> to vector<8x16xf32>
    %36 = arith.mulf %34, %35 : vector<8x16xf32>
    %37 = arith.addf %33, %36 : vector<8x16xf32>
    %38 = vector.extract_strided_slice %14 {offsets = [0, 6], sizes = [8, 16], strides = [1, 1]} : vector<8x22xf32> to vector<8x16xf32>
    %39 = vector.broadcast %8 : vector<8x1xf32> to vector<8x16xf32>
    %40 = arith.mulf %38, %39 : vector<8x16xf32>
    %41 = arith.addf %37, %40 : vector<8x16xf32>
    %42 = vector.broadcast %1 : vector<8x1xf32> to vector<8x16xf32>
    %43 = arith.addf %41, %42 : vector<8x16xf32>
    %c0_10 = arith.constant 0 : index
    %c0_11 = arith.constant 0 : index
    %44 = vector.load %arg6[%c0_10, %c0_11] : memref<8x16xf32, #tpu.memory_space<vmem>>, vector<8x16xf32>
    tpu.vector_store %arg6[%c0_10, %c0_11], %43 {strides = array<i32>} : memref<8x16xf32, #tpu.memory_space<vmem>>, vector<8x16xf32>,
    return
  }
  func.func @transform_0(%arg0: i32, %arg1: i32) -> (i32, i32, i32) {
    %c0_i32 = arith.constant 0 : i32
    %c0_i32_0 = arith.constant 0 : i32
    return %arg1, %arg0, %c0_i32 : i32, i32, i32
  }
  func.func @transform_1(%arg0: i32, %arg1: i32) -> (i32, i32) {
    %c0_i32 = arith.constant 0 : i32
    return %arg0, %arg1 : i32, i32
  }
  func.func @transform_2(%arg0: i32, %arg1: i32) -> (i32, i32) {
    %c0_i32 = arith.constant 0 : i32
    %c0_i32_0 = arith.constant 0 : i32
    return %arg0, %c0_i32 : i32, i32
  }
  func.func @transform_3(%arg0: i32, %arg1: i32) -> (i32, i32) {
    %c0_i32 = arith.constant 0 : i32
    %c0_i32_0 = arith.constant 0 : i32
    return %arg0, %c0_i32 : i32, i32
  }
  func.func @transform_4(%arg0: i32, %arg1: i32) -> (i32, i32) {
    %c0_i32 = arith.constant 0 : i32
    return %arg0, %arg1 : i32, i32
  }
}

</mosaic_0001>

<bundles_post_ra>
// kernel: tpu_custom_call.1
= control target key start
LH: loop header
LB: loop body
LE: loop exit
PB: predicated region body
PF: predicated region fallthrough
CT: control target
= control target key end

     0   :  { %v170_v1 = vmov 3   ;;  %v171_v2 = vmov 1   ;;  %s235_s0 = inlined_call_operand.vmem [shape: f32[1,8,6], index: 0, kind: input, shape index: {}]   ;;  %s236_s1 = inlined_call_operand.vmem [shape: f32[8,16], index: 1, kind: input, shape index: {}]   ;;  %s237_s2 = inlined_call_operand.vmem [shape: f32[8,7], index: 2, kind: input, shape index: {}]   ;;  %s238_s3 = inlined_call_operand.vmem [shape: f32[8,1], index: 3, kind: input, shape index: {}]   ;;  %s239_s4 = inlined_call_operand.hbm [shape: f32[8,16], index: 4, kind: output, shape index: {}]  }
   0x1   :  { %v18_v0 = vld [vmem:[%s237_s2] sm:$0xff]  ;;  %140 = vset.pattern.permute.xlu1 %v170_v1  ;;  %138 = vset.pattern.permute.xlu0 %v171_v2 }
   0x2   :  { %61 = vperm.xlu1 %140, %v18_v0   ;;  %41 = vperm.xlu0 %138, %v18_v0  }
   0x3   :  { %9 = vsyncpa [#allocation3], 0  ;;  %v21_v3 = vld [vmem:[%s236_s1] sm:$0xff]  ;;  %s172_s19 = smov 3   ;;  %v173_v4 = vmov 2   ;;  %v174_v6 = vmov 5  }
   0x4   :  { %v20_v5 = vld [vmem:[%s235_s0] sm:$0xff]  ;;  %s175_s2 = smov 16   ;;  %v176_v7 = vmov 4   ;;  %v177_v8 = vmov 0   ;;  %v178_v9 = vmov 6   ;;  %vm30_vm0 = vcmask 23552  }
   0x5   :  { %vm32_vm1 = vcmask 154624   ;;  %s179_s0 = smov 125   ;;  %s180_s1 = smov 127   ;;  %v19_v24 = vld [vmem:[%s238_s3] sm:$0xff]  ;;  %vm106_vm2 = vcmask 130048  }
   0x6   :  { %23 = vrot.lane.b32.xlu1 %v21_v3, %s172_s19  ;;  %139 = vset.pattern.permute.xlu0 %v173_v4  ;;  %s181_s22 = smov 126   ;;  %s182_s23 = smov 124  }
   0x7   :  { %51 = vperm.xlu0 %139, %v18_v0   ;;  %142 = vset.pattern.permute.xlu1 %v174_v6  ;;  %s183_s26 = smov 122   ;;  %s184_s27 = smov 123  }
   0x8   :  { %s185_s3 = smov [#allocation2]  }
   0x9   :  { %s114_s28 = sshll.u32 %s185_s3, 4  ;;  %s115_s28 = int_to_ptr.vmem [resolvable:$true] %s114_s28 }
   0xa   :  { %27 = vrot.lane.b32.xlu1 %v20_v5, %s175_s2  ;;  %s146_s29 = scalar_lea.vmem %s115_s28, 128  ;;  %p151_p1 = scmp.lt.s32.totalorder %s115_s28, %s115_s28 }
   0xb   :  { %141 = vset.pattern.permute.xlu0 %v176_v7  ;;  %p147_p0 = scmp.ne.s32.totalorder %s115_s28, %s146_s29  ;;  %p152_p2 = scmp.lt.s32.totalorder %s146_s29, %s146_s29 }
   0xc   :  { %71 = vperm.xlu0 %141, %v18_v0  }
   0xd   :  { %p153_p3 = por %p152_p2, %p151_p1 }
   0xe   :  { %81 = vperm.xlu1 %142, %v18_v0  }
   0xf   :  { %p154_p4 = pnand %p153_p3, %p147_p0 }
  0x10   :  { %144 = vset.pattern.permute.xlu0 %v177_v8 }
  0x11   :  { %36 = vperm.xlu0 %144, %v18_v0  }
  0x12   :  { %143 = vset.pattern.permute.xlu1 %v178_v9 }
  0x13   :  { %91 = vperm.xlu1 %143, %v18_v0  }
  0x17   :  { %145 = vset.pattern.permute.xlu1 %v177_v8 }
  0x81   :  { %v62_v10 = vpop.permute.xlu1 %61  ;;  %v42_v11 = vpop.permute.xlu0 %41 }
  0x85   :  { %v24_v12 = vpop.permute.xlu1 %23 }
  0x86   :  { %v52_v13 = vpop.permute.xlu0 %51  ;;  %v31_v14 = vsel %vm30_vm0, %v20_v5, %v24_v12 }
  0x89   :  { %v28_v15 = vpop.permute.xlu1 %27 }
  0x8a   :  { %v33_v16 = vsel %vm32_vm1, %v31_v14, %v28_v15 }
  0x8b   :  { %v64_v17 = vmul.f32 %v62_v10, %v33_v16  ;;  %v44_v18 = vmul.f32 %v42_v11, %v33_v16  ;;  %v72_v19 = vpop.permute.xlu0 %71  ;;  %v54_v22 = vmul.f32 %v52_v13, %v33_v16 }
  0x8c   :  { %v74_v21 = vmul.f32 %v72_v19, %v33_v16 }
  0x8d   :  { %v82_v20 = vpop.permute.xlu1 %81  ;;  %66 = vrot.lane.b32.xlu0 %v64_v17, %s179_s0  ;;  %46 = vrot.lane.b32.xlu1 %v44_v18, %s180_s1 }
  0x8e   :  { %v84_v26 = vmul.f32 %v82_v20, %v33_v16 }
  0x90   :  { %v37_v28 = vpop.permute.xlu0 %36 }
  0x91   :  { %56 = vrot.lane.b32.xlu1 %v54_v22, %s181_s22  ;;  %76 = vrot.lane.b32.xlu0 %v74_v21, %s182_s23  ;;  %v39_v29 = vmul.f32 %v37_v28, %v33_v16 }
  0x92   :  { %v92_v23 = vpop.permute.xlu1 %91 }
  0x93   :  { %v94_v25 = vmul.f32 %v92_v23, %v33_v16 }
  0x95   :  { %102 = vperm.xlu1 %145, %v19_v24   ;;  %96 = vrot.lane.b32.xlu0 %v94_v25, %s183_s26 }
  0x99   :  { %86 = vrot.lane.b32.xlu1 %v84_v26, %s184_s27 }
  0xff   :  { %v47_v27 = vpop.permute.xlu1 %46  ;;  %v67_v32 = vpop.permute.xlu0 %66 }
 0x100   :  { %v49_v31 = vadd.f32 %v47_v27, %v39_v29 }
 0x103   :  { %v57_v30 = vpop.permute.xlu1 %56  ;;  %v77_v35 = vpop.permute.xlu0 %76 }
 0x104   :  { %v59_v33 = vadd.f32 %v57_v30, %v49_v31 }
 0x106   :  { %v69_v34 = vadd.f32 %v67_v32, %v59_v33 }
 0x107   :  { %v97_v40 = vpop.permute.xlu0 %96 }
 0x108   :  { %v79_v37 = vadd.f32 %v77_v35, %v69_v34 }
 0x114   :  { %v103_v36 = vpop.permute.xlu1 %102 }
 0x118   :  { %v87_v38 = vpop.permute.xlu1 %86 }
 0x119   :  { %v89_v39 = vadd.f32 %v87_v38, %v79_v37 }
 0x11b   :  { %v99_v41 = vadd.f32 %v97_v40, %v89_v39 }
 0x11d   :  { %v105_v42 = vadd.f32 %v103_v36, %v99_v41 }
 0x11f   :  { %107 = vst.msk [vmem:[#allocation2] sm:$0xff] %vm106_vm2, %v105_v42 }
 0x120   :  { %157 = shalt.err (!%p154_p4)
}
 0x121   :  { %s158_s6 = scalar_lea.hbm %s239_s4, 128 }
 0x122   :  { %p159_p5 = scmp.ne.s32.totalorder %s239_s4, %s158_s6  ;;  %p162_p6 = scmp.lt.u32.totalorder %s158_s6, %s239_s4 }
 0x124   :  { %p164_p7 = pnand %p162_p6, %p159_p5 }
 0x126   :  { %167 = shalt.err (!%p164_p7)
}
 0x127   :  { %117 = dma.vmem_to_hbm [thread:$0]  %s115_s28, 128, %s239_s4, [#allocation3]  }
 0x128   :  { %168 = dma.done.wait [#allocation3], 128  }
 0x129   :  { %169 = vsyncadd [#allocation3], 4294967168 }
 0x12a   :  { %121 = vsyncpa [#allocation3], 1 }

</bundles_post_ra>
